<compile_context>
chip_gen: v7x
topology: tpu7x:2x2x1
jax: 0.10.0
libtpu: 0.0.40
codegen_flags: <defaults>
</compile_context>

<pallas_src>
import functools
import math

import numpy as np
import jax
import jax.numpy as jnp
from jax.experimental import pallas as pl
from jax.experimental.pallas import tpu as pltpu


def _time_enc_kernel(t_ref, w_ref, b_ref, o_ref):
    """o[r, j] = cos(t[r, j // C] * W[j % C] + b[j % C]).

    t_ref: (TR, P)  packed time samples (P consecutive samples per slab row).
    w_ref: (P, L)   group-masked weights, L = P*C (resident across the grid).
    b_ref: (1, L)   channel bias tiled P times (resident).
    o_ref: (TR, L)  lane-dense output block (L a multiple of 128).
    """
    # All affine work on the MXU (full f32 precision); VPU does only the bias add,
    # EUP does the cos.  Exactly one nonzero weight per lane -> elementwise rounding.
    s = jnp.dot(t_ref[...], w_ref[...],
                preferred_element_type=jnp.float32,
                precision=jax.lax.Precision.HIGHEST)
    o_ref[...] = jnp.cos(s + b_ref[...]).astype(o_ref.dtype)


@functools.partial(jax.jit, static_argnames=("tile_rows", "out_dtype"))
def time_encoder_forward(t, weight, bias, *, tile_rows: int = 4096,
                         out_dtype=jnp.float32):
    """Equivalent of TimeEncoder.forward.

    t:      any shape (flattened to (-1, 1) like the module).
    weight: (out_channels, 1)  (torch nn.Linear layout, in_features == 1)
    bias:   (out_channels,)
    Returns (N, out_channels) in out_dtype (float32 by default to match the module;
    pass jnp.bfloat16 to roughly halve the HBM writeback, which dominates traffic).
    """
    out_dtype = jnp.dtype(out_dtype)
    t_flat = jnp.reshape(t, (-1,)).astype(jnp.float32)
    n = t_flat.shape[0]
    c = int(weight.shape[0])

    w_vec = jnp.reshape(weight.astype(jnp.float32), (c,))   # W[:, 0]
    b_vec = jnp.reshape(bias.astype(jnp.float32), (c,))

    if n == 0:                                   # empty input -> no kernel launch
        return jnp.zeros((0, c), out_dtype)

    # ---- Lane packing: every output block is (rows, lanes) with lanes % 128 == 0 ----
    lcm = math.lcm(c, 128)
    if lcm <= 1024:
        # Common case: free row-major repack, no dummy channels, no column slice.
        c_pad, p, lanes = c, lcm // c, lcm
    else:
        # Awkward C (e.g. 200): pad channels to the next multiple of 128 so stores
        # stay unmasked; dummy columns are dropped wrapper-side.
        c_pad = ((c + 127) // 128) * 128
        p, lanes = 1, c_pad
        w_vec = jnp.pad(w_vec, (0, c_pad - c))
        b_vec = jnp.pad(b_vec, (0, c_pad - c))

    pad = (-n) % p                               # tiny pad only when N % P != 0
    if pad:
        t_flat = jnp.pad(t_flat, (0, pad))
    n_pad = n + pad
    n_slab = n_pad // p
    t_slab = t_flat.reshape(n_slab, p)

    # Group-masked weights: W_exp[g, j] = W[j % c_pad] if j // c_pad == g else 0.
    w_tiled = jnp.tile(w_vec, p)                                          # (lanes,)
    grp = jnp.arange(lanes, dtype=jnp.int32) // c_pad
    w_expand = jnp.where(grp[None, :] == jnp.arange(p, dtype=jnp.int32)[:, None],
                         w_tiled[None, :], 0.0)                           # (p, lanes)
    b_tiled = jnp.tile(b_vec, p)[None, :]                                 # (1, lanes)

    # ---- Row tiling ----
    out_itemsize = out_dtype.itemsize
    sub = 16 if out_itemsize < 4 else 8          # sublane granularity of the output

    # VMEM: the (tr, p) f32 t-block lane-pads to (tr, 128) in VMEM and is
    # double-buffered, same as the output block.  Keep 2*(t + out) under ~12 MiB so
    # v5e's 16 MiB scoped-VMEM default is never exceeded (v6e/v7x have more headroom).
    vmem_budget = 12 * 1024 * 1024
    bytes_per_row = 2 * (128 * 4 + lanes * out_itemsize)
    max_tr = max(sub, vmem_budget // bytes_per_row)

    tr = max(sub, min(int(tile_rows), max_tr, n_slab))
    if tr >= n_slab and n_slab > sub:
        # Would be a 1-step grid: split so both v7x TensorCores get work
        # (harmless on single-TC v5e/v6e).
        tr = (n_slab + 1) // 2
    tr = ((tr + sub - 1) // sub) * sub
    grid = (pl.cdiv(n_slab, tr),)

    cost = pl.CostEstimate(
        flops=2 * n_slab * p * lanes + n_slab * lanes,
        transcendentals=n_slab * lanes,
        bytes_accessed=4 * n_pad + out_itemsize * n_slab * lanes + 4 * (p + 1) * lanes,
    )

    out_slab = pl.pallas_call(
        _time_enc_kernel,
        out_shape=jax.ShapeDtypeStruct((n_slab, lanes), out_dtype),
        grid_spec=pltpu.PrefetchScalarGridSpec(
            num_scalar_prefetch=0,
            grid=grid,
            in_specs=[
                pl.BlockSpec((tr, p), lambda i: (i, 0)),       # packed t tile
                pl.BlockSpec((p, lanes), lambda i: (0, 0)),    # masked weights (resident)
                pl.BlockSpec((1, lanes), lambda i: (0, 0)),    # tiled bias (resident)
            ],
            out_specs=pl.BlockSpec((tr, lanes), lambda i: (i, 0)),
        ),
        compiler_params=pltpu.CompilerParams(
            dimension_semantics=("parallel",),                 # shards across TCs on v7x
        ),
        cost_estimate=cost,
    )(t_slab, w_expand, b_tiled)

    out = out_slab.reshape(n_pad, c_pad)      # free row-major reshape of the slab
    if c_pad != c:
        out = out[:, :c]                      # drop dummy channels (awkward-C fallback)
    if pad:
        out = out[:n]                         # only when N % P != 0
    return out


def _reference(t, weight, bias):
    # Same elementwise formulation as Linear(1, C) followed by cos (pure VPU/EUP,
    # no dots, so it is exact f32).
    t_col = jnp.reshape(t, (-1, 1)).astype(jnp.float32)
    w_row = jnp.reshape(weight.astype(jnp.float32), (1, -1))
    return jnp.cos(t_col * w_row + bias.astype(jnp.float32)[None, :])


if __name__ == "__main__":
    out_channels = 32
    n_events = 200  # deliberately not a multiple of the row tile / pack factor

    key = jax.random.PRNGKey(0)
    k_t, k_w, k_b = jax.random.split(key, 3)

    # nn.Linear(1, C) init: kaiming-uniform with fan_in=1 -> bound 1.0.
    weight = jax.random.uniform(k_w, (out_channels, 1), jnp.float32, -1.0, 1.0)
    bias = jax.random.uniform(k_b, (out_channels,), jnp.float32, -1.0, 1.0)

    # Small-argument check: validates kernel math (packing / channel mapping) and the
    # full-precision MXU affine.  A single-pass-bf16 affine would miss by ~1e-2 here;
    # a multi-pass f32 MXU decomposition stays well under this bound.
    t_small = jax.random.uniform(k_t, (n_events,), jnp.float32, 0.0, 6.283)
    out_s = jax.block_until_ready(time_encoder_forward(t_small, weight, bias))
    ref_s = _reference(t_small, weight, bias)
    assert out_s.shape == (n_events, out_channels), out_s.shape
    err_s = float(jnp.max(jnp.abs(out_s - ref_s)))
    assert err_s < 2e-4, err_s

    # Realistic large timestamps: |t*W| reaches ~1e3, where f32 has ulp ~6e-5 on the
    # cos argument, so any implementation has at best a few significant decimals.
    # This check is about shape / channel mapping at realistic magnitudes, not ulps.
    t_big = jax.random.uniform(k_t, (n_events,), jnp.float32, 0.0, 1000.0)
    out_b = jax.block_until_ready(time_encoder_forward(t_big, weight, bias))
    ref_b = _reference(t_big, weight, bias)
    assert out_b.shape == (n_events, out_channels), out_b.shape
    err_b = float(jnp.max(jnp.abs(out_b - ref_b)))
    assert err_b < 2e-2, err_b

    # bf16 writeback path (halves the dominant HBM traffic; 16-row sublane tiles).
    out_h = jax.block_until_ready(
        time_encoder_forward(t_small, weight, bias, out_dtype=jnp.bfloat16))
    err_h = float(jnp.max(jnp.abs(out_h.astype(jnp.float32) - ref_s)))
    assert out_h.dtype == jnp.bfloat16 and err_h < 8e-3, (out_h.dtype, err_h)

    # Awkward channel count (128 % C != 0): exercises the generalized lcm packing
    # (C=20 -> P=32, lanes=640), still unmasked lane-dense stores.
    c2 = 20
    w2 = jax.random.uniform(k_w, (c2, 1), jnp.float32, -1.0, 1.0)
    b2 = jax.random.uniform(k_b, (c2,), jnp.float32, -1.0, 1.0)
    out_2 = jax.block_until_ready(time_encoder_forward(t_small, w2, b2))
    ref_2 = _reference(t_small, w2, b2)
    assert out_2.shape == (n_events, c2), out_2.shape
    err_2 = float(jnp.max(jnp.abs(out_2 - ref_2)))
    assert err_2 < 2e-4, err_2

    print("KERNEL_OK")
</pallas_src>

<mosaic_0001>
module attributes {stable_mosaic.version = 11 : i64} {
  func.func @_time_enc_kernel(%arg0: i32, %arg1: memref<32x4xf32, #tpu.memory_space<vmem>>, %arg2: memref<4x128xf32, #tpu.memory_space<vmem>>, %arg3: memref<1x128xf32, #tpu.memory_space<vmem>>, %arg4: memref<32x128xf32, #tpu.memory_space<vmem>>) attributes {dimension_semantics = [#tpu.dimension_semantics<parallel>], iteration_bounds = array<i64: 2>, scalar_prefetch = 0 : i64, scratch_operands = 0 : i64, tpu.core_type = #tpu.core_type<tc>, window_params = [{transform_indices = @transform_0, window_bounds = array<i64: 32, 4>}, {pipeline_mode = #tpu.pipeline_mode<synchronous>, transform_indices = @transform_1, window_bounds = array<i64: 4, 128>}, {pipeline_mode = #tpu.pipeline_mode<synchronous>, transform_indices = @transform_2, window_bounds = array<i64: 1, 128>}, {transform_indices = @transform_3, window_bounds = array<i64: 32, 128>}]} {
    %c0 = arith.constant 0 : index
    %c0_0 = arith.constant 0 : index
    %0 = vector.load %arg1[%c0, %c0_0] : memref<32x4xf32, #tpu.memory_space<vmem>>, vector<32x4xf32>
    %c0_1 = arith.constant 0 : index
    %c0_2 = arith.constant 0 : index
    %1 = vector.load %arg2[%c0_1, %c0_2] : memref<4x128xf32, #tpu.memory_space<vmem>>, vector<4x128xf32>
    %cst = arith.constant dense<0.000000e+00> : vector<32x128xf32>
    %2 = tpu.matmul %0, %1, %cst {dimension_numbers = #tpu.dot_dimension_numbers<[1], [0], [0], [1], [0, 0, 1, 1], [], []>, precision = #tpu.contract_precision<fp32>} : vector<32x4xf32>, vector<4x128xf32>, vector<32x128xf32> -> vector<32x128xf32>
    %c0_3 = arith.constant 0 : index
    %c0_4 = arith.constant 0 : index
    %3 = vector.load %arg3[%c0_3, %c0_4] : memref<1x128xf32, #tpu.memory_space<vmem>>, vector<1x128xf32>
    %4 = vector.broadcast %3 : vector<1x128xf32> to vector<32x128xf32>
    %5 = arith.addf %2, %4 : vector<32x128xf32>
    %6 = math.cos %5 : vector<32x128xf32>
    %c0_5 = arith.constant 0 : index
    %c0_6 = arith.constant 0 : index
    %7 = vector.load %arg4[%c0_5, %c0_6] : memref<32x128xf32, #tpu.memory_space<vmem>>, vector<32x128xf32>
    tpu.vector_store %arg4[%c0_5, %c0_6], %6 {strides = array<i32>} : memref<32x128xf32, #tpu.memory_space<vmem>>, vector<32x128xf32>,
    return
  }
  func.func @transform_0(%arg0: i32) -> (i32, i32) {
    %c0_i32 = arith.constant 0 : i32
    %c0_i32_0 = arith.constant 0 : i32
    return %arg0, %c0_i32 : i32, i32
  }
  func.func @transform_1(%arg0: i32) -> (i32, i32) {
    %c0_i32 = arith.constant 0 : i32
    %c0_i32_0 = arith.constant 0 : i32
    %c0_i32_1 = arith.constant 0 : i32
    return %c0_i32, %c0_i32_0 : i32, i32
  }
  func.func @transform_2(%arg0: i32) -> (i32, i32) {
    %c0_i32 = arith.constant 0 : i32
    %c0_i32_0 = arith.constant 0 : i32
    %c0_i32_1 = arith.constant 0 : i32
    return %c0_i32, %c0_i32_0 : i32, i32
  }
  func.func @transform_3(%arg0: i32) -> (i32, i32) {
    %c0_i32 = arith.constant 0 : i32
    %c0_i32_0 = arith.constant 0 : i32
    return %arg0, %c0_i32 : i32, i32
  }
}

</mosaic_0001>

<bundles_post_ra>
// kernel: tile.11
= control target key start
LH: loop header
LB: loop body
LE: loop exit
PB: predicated region body
PF: predicated region fallthrough
CT: control target
= control target key end

     0   :  { %s22_s0 = inlined_call_operand.vmem [shape: f32[32], index: 0, kind: input, shape index: {}]   ;;  %s23_s1 = inlined_call_operand.vmem [shape: f32[4,32], index: 1, kind: output, shape index: {}]  }
   0x1   :  { %v4_v0 = vld [vmem:[%s22_s0] ss:$0 sm:$0xff] }
   0x2   :  { %5 = vst [vmem:[%s23_s1] sm:$0xf] %v4_v0 }

// kernel: tile.17
= control target key start
LH: loop header
LB: loop body
LE: loop exit
PB: predicated region body
PF: predicated region fallthrough
CT: control target
= control target key end

     0   :  { %vm7_vm0 = vcmask 261120   ;;  %s37_s8 = smov 32   ;;  %s38_s9 = smov 64   ;;  %vm13_vm1 = vcmask 1048320   ;;  %vm19_vm2 = vcmask 785920   ;;  %vm25_vm3 = vcmask 523520   ;;  %s55_s0 = inlined_call_operand.vmem [shape: f32[4,32], index: 0, kind: input, shape index: {}]   ;;  %s56_s1 = inlined_call_operand.vmem [shape: f32[1,128], index: 1, kind: output, shape index: {}]  }
   0x1   :  { %v4_v0 = vld [vmem:[%s55_s0] sm:$0xf]  ;;  %s36_s0 = smov 96  }
   0x2   :  { %5 = vst [vmem:[#allocation1] sm:$0xf] %v4_v0 }
   0x9   :  { %v10_v1 = vld [vmem:[#allocation1 + $0x3] sm:$0x1]   ;;  %v22_v2 = vld [vmem:[#allocation1 + $0x1] sm:$0x1]   ;;  %v6_v3 = vld [vmem:[#allocation1] sm:$0x1]  }
   0xa   :  { %11 = vrot.lane.b32.xlu0 %v10_v1, %s36_s0  ;;  %23 = vrot.lane.b32.xlu1 %v22_v2, %s37_s8  ;;  %v16_v4 = vld [vmem:[#allocation1 + $0x2] sm:$0x1]   ;;  %8 = vst.msk [vmem:[#allocation0] sm:$0x1] %vm7_vm0, %v6_v3  }
   0xe   :  { %17 = vrot.lane.b32.xlu0 %v16_v4, %s38_s9 }
  0x7c   :  { %v12_v5 = vpop.permute.xlu0 %11   ;;  %v24_v6 = vpop.permute.xlu1 %23  }
  0x7d   :  { %14 = vst.msk [vmem:[#allocation0] sm:$0x1] %vm13_vm1, %v12_v5  }
  0x80   :  { %v18_v7 = vpop.permute.xlu0 %17  }
  0x81   :  { %20 = vst.msk [vmem:[#allocation0] sm:$0x1] %vm19_vm2, %v18_v7  }
  0x82   :  { %26 = vst.msk [vmem:[#allocation0] sm:$0x1] %vm25_vm3, %v24_v6  }
  0x89   :  { %v30_v8 = vld [vmem:[#allocation0] sm:$0x1] }
  0x8a   :  { %32 = vst [vmem:[%s56_s1] sm:$0x1] %v30_v8 }

// kernel: time_encoder_forward.1
= control target key start
LH: loop header
LB: loop body
LE: loop exit
PB: predicated region body
PF: predicated region fallthrough
CT: control target
= control target key end

     0   :  { %s1825_s12 = smov 0   ;;  %s1827_s13 = smov 0   ;;  %s2212_s0 = inlined_call_operand.vmem [shape: f32[50,4], index: 0, kind: input, shape index: {}]   ;;  %s2213_s1 = inlined_call_operand.vmem [shape: f32[4,128], index: 1, kind: input, shape index: {}]   ;;  %s2214_s2 = inlined_call_operand.vmem [shape: f32[1,128], index: 2, kind: input, shape index: {}]   ;;  %s2215_s3 = inlined_call_operand.vmem [shape: f32[50,128], index: 3, kind: output, shape index: {}]  }
   0x1   :  { %s1829_s14 = smov 0  }
   0x2 LB: > { %s1838_s15 = sadd.s32 4294967295, %s1765_s14   ;;  %s1840_s16 = sadd.s32 1, %s1765_s14   ;;  %s1765_s14 = sphi %s1829_s14, %s2226_s14   ;;  %s1761_s13 = sphi %s1827_s13, %s2225_s13   ;;  %s1757_s12 = sphi %s1825_s12, %s2224_s12  }
   0x3   : > { %s85_s17 = ssub.s32 %s1765_s14, %s1840_s16  ;;  %s88_s18 = sadd.s32 1, %s1761_s13 }
   0x4   : > { %p86_p0 = scmp.eq.s32.totalorder %s85_s17, 0  ;;  %p98_p1 = scmp.ne.s32.totalorder %s1761_s13, %s1757_s12 }
   0x5   : > { %p99_p2 = scmp.eq.s32.totalorder %s1838_s15, 1  ;;  %p1442_p3 = scmp.ge.s32.totalorder %s1765_s14, 1 }
   0x6   : > { %s1848_s19 = scalar_select %p86_p0, %s1761_s13, %s88_s18  }
   0x7   : > { %p1850_p4 = por %p99_p2, %p98_p1  ;;  %p146_p5 = scmp.lt.s32.totalorder %s1765_s14, 3 }
   0x9   : > { %p147_p6 = pnand %p1442_p3, %p146_p5 }
   0xa   : > { %v196_v0 = vld [vmem:[%s2213_s1] sm:$0xf] (!%p147_p6)  ;;  %vm217_vm0 = vcmask (!%p147_p6), 1043456   ;;  %s1858_s23 = sshll.u32 (!%p147_p6), %s1838_s15, 2  ;;  %vm204_vm1 = vcmask (!%p147_p6), 31744   ;;  %s170_s4 = sand.u32 (!%p147_p6), 1, %s1757_s12  }
   0xb   : > { %150 = sbr.rel (%p147_p6) target bundleno = 454 (0x1c6), region = 32  ;;  %v219_v1 = vsel (!%p147_p6), %vm217_vm0, %v196_v0, 0  ;;  %p178_p7 = scmp.lt.s32.totalorder (!%p147_p6), %s1858_s23, 6  ;;  %v1446_v37 = vld [vmem:[%s2214_s2] ss:$0 sm:$0xff] (!%p147_p6) }
   0xc   : > { %v222_v2 = vand.u32 (!%p147_p6), 4294901760, %v219_v1  ;;  %s1443_s5 = sshll.u32 (!%p147_p6), %s170_s4, 5 }
   0xd   : > { %s2121_s6 = scalar_lea.vmem (!%p147_p6), [#allocation2], %s1443_s5  }
   0xe   : > { %1537 = vmatprep.subr.mxu0 (!%p147_p6), %v222_v2  ;;  %1513 = vmatprep.subr.mxu1 (!%p147_p6), %v222_v2  ;;  %v329_v3 = vsub.f32 (!%p147_p6), %v219_v1, %v222_v2 }
   0xf   : > { %1538 = vmatpush3.msra.mxu0 (!%p147_p6), %v222_v2  ;;  %1514 = vmatpush3.msra.mxu1 (!%p147_p6), %v222_v2 }
  0x10   : > { %v330_v4 = vand.u32 (!%p147_p6), 4294901760, %v329_v3 }
  0x12   : > { %s179_s24 = scalar_select %p178_p7, %s1858_s23, 6  ;;  %v331_v10 = vsub.f32 %v329_v3, %v330_v4  ;;  %1545 = vmatprep.subr.mxu0 %v330_v4 }
  0x13   : > { %s1220_s7 = ssub.s32 (%p1850_p4), 7, %s1858_s23  ;;  %s1480_s8 = sshll.u32 (%p1850_p4), %s1838_s15, 5 }
  0x14   : > { %s1445_s25 = sshll.u32 %s179_s24, 3  ;;  %v332_v17 = vand.u32 4294901760, %v331_v10  ;;  %p1221_p8 = scmp.lt.s32.totalorder (%p1850_p4), %s1220_s7, 4 }
  0x15   : > { %s181_s28 = scalar_lea.vmem %s2212_s0, %s1445_s25  ;;  %s2163_s11 = scalar_lea.vmem (%p1850_p4), %s2215_s3, %s1480_s8  }
  0x16   : > { %v192_v5 = vld [vmem:[%s181_s28] sm:$0xff]  ;;  %v193_v6 = vld [vmem:[%s181_s28 + $0x8] sm:$0xff]  ;;  %v194_v7 = vld [vmem:[%s181_s28 + $0x10] sm:$0xff]  ;;  %1521 = vmatprep.subr.mxu1 %v332_v17 }
  0x17   : > { %v206_v8 = vsel %vm204_vm1, %v192_v5, 0  ;;  %v209_v9 = vsel %vm204_vm1, %v193_v6, 0  ;;  %v212_v11 = vsel %vm204_vm1, %v194_v7, 0  ;;  %v195_v12 = vld [vmem:[%s181_s28 + $0x18] sm:$0xff] }
  0x18   : > { %v287_v13 = vand.u32 4294901760, %v206_v8  ;;  %v297_v14 = vand.u32 4294901760, %v209_v9  ;;  %v307_v15 = vand.u32 4294901760, %v212_v11  ;;  %v215_v16 = vsel %vm204_vm1, %v195_v12, 0 }
  0x19   : > { %v317_v18 = vand.u32 4294901760, %v215_v16 }
  0x1a   : > { %v288_v19 = vsub.f32 %v206_v8, %v287_v13  ;;  %v298_v20 = vsub.f32 %v209_v9, %v297_v14  ;;  %v308_v21 = vsub.f32 %v212_v11, %v307_v15 }
  0x1b   : > { %v318_v22 = vsub.f32 %v215_v16, %v317_v18 }
  0x1c   : > { %v289_v23 = vand.u32 4294901760, %v288_v19  ;;  %v299_v24 = vand.u32 4294901760, %v298_v20  ;;  %v309_v25 = vand.u32 4294901760, %v308_v21 }
  0x1d   : > { %v319_v26 = vand.u32 4294901760, %v318_v22 }
  0x1e   : > { %1539 = vmatprep.mubr.f32.mxu0 %v289_v23  ;;  %v290_v27 = vsub.f32 %v288_v19, %v289_v23  ;;  %v300_v28 = vsub.f32 %v298_v20, %v299_v24  ;;  %v310_v29 = vsub.f32 %v308_v21, %v309_v25  ;;  %v1803_v23 = vmov 920167782  }
  0x1f   : > { %1540 = vmatmul.mubr.f32.vlgmr.msra.gmra.mrb[0].mxu0 %v299_v24  ;;  %v320_v30 = vsub.f32 %v318_v22, %v319_v26 }
  0x20   : > { %v291_v31 = vand.u32 4294901760, %v290_v27  ;;  %1542 = vmatprep.mubr.f32.mxu0 %v309_v25  ;;  %v301_v32 = vand.u32 4294901760, %v300_v28  ;;  %1546 = vmatpush3.msra.mxu0 %v330_v4  ;;  %v311_v33 = vand.u32 4294901760, %v310_v29 }
  0x21   : > { %1553 = vmatprep.subr.mxu0 %v222_v2  ;;  %v321_v34 = vand.u32 4294901760, %v320_v30  ;;  %v1804_v30 = vmov 1326507024  }
  0x22   : > { %1515 = vmatprep.mubr.f32.mxu1 %v291_v31 }
  0x23   : > { %1516 = vmatmul.mubr.f32.vlgmr.msra.gmra.mrb[0].mxu1 %v301_v32  ;;  %1543 = vmatmul.mubr.f32.gmra.mrb[2].mxu0 %v319_v26 }
  0x24   : > { %1522 = vmatpush3.msra.mxu1 %v332_v17  ;;  %1518 = vmatprep.mubr.f32.mxu1 %v311_v33  ;;  %v1800_v17 = vmov 2475754826  }
  0x25   : > { %1547 = vmatprep.mubr.f32.mxu0 %v287_v13  ;;  %1529 = vmatprep.subr.mxu1 %v329_v3 }
  0x27   : > { %1519 = vmatmul.mubr.f32.gmra.mrb[2].mxu1 %v321_v34  ;;  %1548 = vmatmul.mubr.f32.vlgmr.msra.gmra.mrb[0].mxu0 %v297_v14 }
  0x28   : > { %1523 = vmatprep.mubr.f32.mxu1 %v287_v13  ;;  %1550 = vmatprep.mubr.f32.mxu0 %v307_v15 }
  0x29   : > { %1554 = vmatpush3.msra.mxu0 %v222_v2 }
  0x2b   : > { %1524 = vmatmul.mubr.f32.vlgmr.msra.gmra.mrb[0].mxu1 %v297_v14  ;;  %1551 = vmatmul.mubr.f32.gmra.mrb[2].mxu0 %v317_v18 }
  0x2c   : > { %1530 = vmatpush3.msra.mxu1 %v329_v3  ;;  %1526 = vmatprep.mubr.f32.mxu1 %v307_v15 }
  0x2d   : > { %1555 = vmatprep.mubr.f32.mxu0 %v287_v13  ;;  %v1799_v13 = vmov 683565275  }
  0x2f   : > { %1527 = vmatmul.mubr.f32.gmra.mrb[2].mxu1 %v317_v18  ;;  %1556 = vmatmul.mubr.f32.vlgmr.msra.gmra.mrb[0].mxu0 %v297_v14 }
  0x30   : > { %1531 = vmatprep.mubr.f32.mxu1 %v288_v19  ;;  %1558 = vmatprep.mubr.f32.mxu0 %v307_v15  ;;  %v1801_v19 = vmov 2131351028  }
  0x33   : > { %1532 = vmatmul.mubr.f32.vlgmr.msra.gmra.mrb[0].mxu1 %v298_v20  ;;  %1559 = vmatmul.mubr.f32.gmra.mrb[2].mxu0 %v317_v18 }
  0x34   : > { %1534 = vmatprep.mubr.f32.mxu1 %v308_v21  ;;  %v1802_v21 = vmov 2102212464  }
  0x37   : > { %1535 = vmatmul.mubr.f32.gmra.mrb[2].mxu1 %v318_v22 }
 0x102   : > { %v1557_v35 = vpop.f32.mrb[0].mxu0 }
 0x103   : > { %v774_v36 = vpop.f32.mrb[1].mxu0 }
 0x106   : > { %v1533_v38 = vpop.f32.mrb[0].mxu1  ;;  %v1560_v39 = vpop.f32.mrb[2].mxu0 }
 0x107   : > { %v1561_v40 = vadd.f32 %v1533_v38, %v1446_v37  ;;  %v491_v41 = vpop.f32.mrb[1].mxu1  ;;  %v786_v42 = vpop.f32.mrb[3].mxu0 }
 0x108   : > { %v1563_v43 = vadd.f32 %v1446_v37, %v491_v41 }
 0x109   : > { %v1872_v44 = vadd.f32 %v1561_v40, %v1557_v35 }
 0x10a   : > { %v1874_v45 = vadd.f32 %v1563_v43, %v774_v36  ;;  %v1536_v46 = vpop.f32.mrb[2].mxu1 }
 0x10b   : > { %v899_v47 = vand.u32 2147483647, %v1872_v44  ;;  %v902_v48 = vand.u32 2139095040, %v1872_v44  ;;  %v505_v49 = vpop.f32.mrb[3].mxu1  ;;  %v1565_v53 = vadd.f32 %v1536_v46, %v1446_v37  ;;  %vm901_vm15 = vcmp.lt.s32.totalorder %v1872_v44, 0 }
 0x10c   : > { %v796_v50 = vand.u32 2147483647, %v1874_v45  ;;  %v799_v51 = vand.u32 2139095040, %v1874_v45  ;;  %v1567_v57 = vadd.f32 %v1446_v37, %v505_v49 }
 0x10d   : > { %v903_v52 = vshrl.u32 %v902_v48, 23  ;;  %v906_v54 = vand.u32 8388607, %v899_v47  ;;  %v1884_v59 = vadd.f32 %v1565_v53, %v1560_v39 }
 0x10e   : > { %v800_v55 = vshrl.u32 %v799_v51, 23  ;;  %v803_v56 = vand.u32 8388607, %v796_v50  ;;  %v1886_v61 = vadd.f32 %v1567_v57, %v786_v42 }
 0x10f   : > { %v1451_v58 = vadd.s32 4294967169, %v903_v52  ;;  %v907_v63 = vor.u32 8388608, %v906_v54  ;;  %v1108_v2 = vand.u32 2139095040, %v1884_v59  ;;  %v1105_v11 = vand.u32 2147483647, %v1884_v59 }
 0x110   : > { %v1447_v60 = vadd.s32 4294967169, %v800_v55  ;;  %v804_v0 = vor.u32 8388608, %v803_v56 }
 0x111   : > { %v909_v62 = vadd.s32 1, %v1451_v58  ;;  %v1109_v4 = vshrl.u32 %v1108_v2, 23  ;;  %v1889_v8 = vshll.u32 %v907_v63, 8 }
 0x112   : > { %v806_v1 = vadd.s32 1, %v1447_v60  ;;  %v1893_v10 = vshll.u32 %v804_v0, 8 }
 0x113   : > { %vm910_vm2 = vcmp.gt.s32.totalorder %v909_v62, 0  ;;  %v1897_v16 = vadd.s32 4294967169, %v1109_v4 }
 0x114   : > { %v911_v3 = vsel %vm910_vm2, %v909_v62, 0  ;;  %vm807_vm3 = vcmp.gt.s32.totalorder %v806_v1, 0 }
 0x115   : > { %v912_v5 = vshrl.u32 %v911_v3, 5  ;;  %v913_v6 = vand.u32 31, %v911_v3  ;;  %v808_v7 = vsel %vm807_vm3, %v806_v1, 0 }
 0x116   : > { %v1891_v9 = vshrl.u32 %v808_v7, 5  ;;  %v810_v15 = vand.u32 31, %v808_v7 }
 0x117   : > { %v914_v12 = vsub.s32 32, %v913_v6  ;;  %v916_v14 = vshll.u32 %v1799_v13, %v913_v6  ;;  %v919_v18 = vshll.u32 %v1800_v17, %v913_v6  ;;  %v922_v20 = vshll.u32 %v1801_v19, %v913_v6 }
 0x118   : > { %v925_v22 = vshll.u32 %v1802_v21, %v913_v6  ;;  %v928_v24 = vshll.u32 %v1803_v23, %v913_v6  ;;  %vm931_vm4 = vcmp.lt.s32.totalorder %v912_v5, 1  ;;  %vm932_vm5 = vcmp.lt.s32.totalorder %v912_v5, 2 }
 0x119   : > { %v917_v25 = vshrl.u32 %v1800_v17, %v914_v12  ;;  %v920_v26 = vshrl.u32 %v1801_v19, %v914_v12  ;;  %v923_v27 = vshrl.u32 %v1802_v21, %v914_v12  ;;  %v915_v28 = vshrl.u32 %v1799_v13, %v914_v12 }
 0x11a   : > { %v926_v29 = vshrl.u32 %v1803_v23, %v914_v12  ;;  %v929_v31 = vshrl.u32 %v1804_v30, %v914_v12  ;;  %v811_v35 = vsub.s32 32, %v810_v15  ;;  %vm933_vm6 = vcmp.lt.s32.totalorder %v912_v5, 3 }
 0x11b   : > { %v918_v32 = vor.u32 %v917_v25, %v916_v14  ;;  %v921_v33 = vor.u32 %v920_v26, %v919_v18  ;;  %v924_v34 = vor.u32 %v923_v27, %v922_v20  ;;  %vm934_vm7 = vcmp.lt.s32.totalorder %v912_v5, 4 }
 0x11c   : > { %v927_v36 = vor.u32 %v926_v29, %v925_v22  ;;  %v930_v37 = vor.u32 %v929_v31, %v928_v24  ;;  %v813_v48 = vshll.u32 %v1799_v13, %v810_v15  ;;  %v814_v52 = vshrl.u32 %v1800_v17, %v811_v35 }
 0x11d   : > { %v935_v38 = vsel %vm931_vm4, %v915_v28, %v918_v32  ;;  %v936_v39 = vsel %vm934_vm7, %v924_v34, 2102212464  ;;  %v939_v40 = vsel %vm931_vm4, %v918_v32, %v921_v33  ;;  %v943_v41 = vsel %vm931_vm4, %v921_v33, %v924_v34 }
 0x11e   : > { %v937_v42 = vsel %vm933_vm6, %v921_v33, %v936_v39  ;;  %v940_v43 = vsel %vm934_vm7, %v927_v36, 920167782  ;;  %v944_v46 = vsel %vm934_vm7, %v930_v37, 1326507024  ;;  %v816_v53 = vshll.u32 %v1800_v17, %v810_v15 }
 0x11f   : > { %v941_v49 = vsel %vm933_vm6, %v924_v34, %v940_v43  ;;  %v945_v51 = vsel %vm933_vm6, %v927_v36, %v944_v46  ;;  %v938_v54 = vsel %vm932_vm5, %v935_v38, %v937_v42  ;;  %v817_v57 = vshrl.u32 %v1801_v19, %v811_v35 }
 0x120   : > { %v942_v55 = vsel %vm932_vm5, %v939_v40, %v941_v49  ;;  %v946_v56 = vsel %vm932_vm5, %v943_v41, %v945_v51  ;;  %v815_v0 = vor.u32 %v814_v52, %v813_v48  ;;  %v819_v2 = vshll.u32 %v1801_v19, %v810_v15 }
 0x121   : > { %v1920_v58 = vmul.u32.u64.low %v1889_v8, %v946_v56  ;;  %v1921_v60 = vmul.u32.u64.high %v1889_v8, %v946_v56, %v1920_v58  ;;  %v1924_v62 = vmul.u32.u64.low %v1889_v8, %v942_v55  ;;  %v1925_v63 = vmul.u32.u64.high %v1889_v8, %v942_v55, %v1924_v62 }
 0x122   : > { %v818_v1 = vor.u32 %v817_v57, %v816_v53  ;;  %v820_v3 = vshrl.u32 %v1802_v21, %v811_v35  ;;  %v812_v4 = vshrl.u32 %v1799_v13, %v811_v35  ;;  %v822_v5 = vshll.u32 %v1802_v21, %v810_v15 }
 0x123   : > { %v823_v6 = vshrl.u32 %v1803_v23, %v811_v35  ;;  %v826_v7 = vshrl.u32 %v1804_v30, %v811_v35  ;;  %v954_v12 = vmul.u32 %v1889_v8, %v938_v54  ;;  %v825_v18 = vshll.u32 %v1803_v23, %v810_v15 }
 0x124   : > { %v821_v14 = vor.u32 %v820_v3, %v819_v2  ;;  %vm828_vm8 = vcmp.lt.s32.totalorder %v1891_v9, 1  ;;  %vm956_vm9 = vc.u32 %v1921_v60, %v1924_v62  ;;  %v957_v20 = vadd.s32 1, %v1925_v63 }
 0x125   : > { %v824_v22 = vor.u32 %v823_v6, %v822_v5  ;;  %vm829_vm10 = vcmp.lt.s32.totalorder %v1891_v9, 2  ;;  %v827_v24 = vor.u32 %v826_v7, %v825_v18  ;;  %vm830_vm11 = vcmp.lt.s32.totalorder %v1891_v9, 3 }
 0x126   : > { %vm831_vm12 = vcmp.lt.s32.totalorder %v1891_v9, 4  ;;  %v836_v25 = vsel %vm828_vm8, %v815_v0, %v818_v1  ;;  %v958_v8 = vsel %vm956_vm9, %v957_v20, %v1925_v63  ;;  %v840_v15 = vsel %vm828_vm8, %v818_v1, %v821_v14 }
 0x127   : > { %v833_v26 = vsel %vm831_vm12, %v821_v14, 2102212464  ;;  %v837_v27 = vsel %vm831_vm12, %v824_v22, 920167782  ;;  %v959_v28 = vadd.s32 %v958_v8, %v954_v12  ;;  %v832_v29 = vsel %vm828_vm8, %v812_v4, %v815_v0 }
 0x128   : > { %v838_v31 = vsel %vm830_vm11, %v821_v14, %v837_v27  ;;  %v841_v32 = vsel %vm831_vm12, %v827_v24, 1326507024  ;;  %v834_v33 = vsel %vm830_vm11, %v818_v1, %v833_v26  ;;  %v1115_v36 = vadd.s32 1, %v1897_v16 }
 0x129   : > { %v839_v34 = vsel %vm829_vm10, %v836_v25, %v838_v31  ;;  %v842_v35 = vsel %vm830_vm11, %v824_v22, %v841_v32  ;;  %v960_v37 = vadd.s32 536870912, %v959_v28  ;;  %v1112_v43 = vand.u32 8388607, %v1105_v11 }
 0x12a   : > { %v843_v38 = vsel %vm829_vm10, %v840_v15, %v842_v35  ;;  %v1948_v39 = vmul.u32.u64.low %v1893_v10, %v839_v34  ;;  %v1949_v40 = vmul.u32.u64.high %v1893_v10, %v839_v34, %v1948_v39  ;;  %vm1116_vm13 = vcmp.gt.s32.totalorder %v1115_v36, 0 }
 0x12b   : > { %v1953_v41 = vmul.u32.u64.low %v1893_v10, %v843_v38  ;;  %v1954_v42 = vmul.u32.u64.high %v1893_v10, %v843_v38, %v1953_v41  ;;  %v1958_v46 = vshrl.u32 %v960_v37, 30  ;;  %v835_v16 = vsel %vm829_vm10, %v832_v29, %v834_v33 }
 0x12c   : > { %v1117_v48 = vsel %vm1116_vm13, %v1115_v36, 0  ;;  %v854_v52 = vadd.s32 1, %v1949_v40  ;;  %v851_v53 = vmul.u32 %v1893_v10, %v835_v16  ;;  %v1113_v54 = vor.u32 8388608, %v1112_v43 }
 0x12d   : > { %v1119_v49 = vand.u32 31, %v1117_v48  ;;  %v962_v51 = vshll.u32 %v1958_v46, 30  ;;  %vm853_vm14 = vc.u32 %v1954_v42, %v1948_v39  ;;  %v1002_v9 = vand.u32 2147483647, %v1886_v61 }
 0x12e   : > { %v855_v57 = vsel %vm853_vm14, %v854_v52, %v1949_v40  ;;  %v955_v0 = vadd.s32 %v1924_v62, %v1921_v60  ;;  %v1971_v3 = vshll.u32 %v1113_v54, 8  ;;  %v1005_v6 = vand.u32 2139095040, %v1886_v61 }
 0x12f   : > { %v1120_v55 = vsub.s32 32, %v1119_v49  ;;  %v963_v56 = vsub.s32 %v959_v28, %v962_v51  ;;  %v856_v58 = vadd.s32 %v855_v57, %v851_v53  ;;  %v1118_v12 = vshrl.u32 %v1117_v48, 5 }
 0x130   : > { %v1128_v14 = vshll.u32 %v1801_v19, %v1119_v49  ;;  %v1122_v62 = vshll.u32 %v1799_v13, %v1119_v49  ;;  %v1125_v20 = vshll.u32 %v1800_v17, %v1119_v49  ;;  %v1131_v22 = vshll.u32 %v1802_v21, %v1119_v49 }
 0x131   : > { %v965_v63 = vsub.s32 0, %v963_v56  ;;  %v857_v1 = vadd.s32 536870912, %v856_v58  ;;  %v1129_v2 = vshrl.u32 %v1802_v21, %v1120_v55  ;;  %v1123_v4 = vshrl.u32 %v1800_v17, %v1120_v55 }
 0x132   : > { %v1126_v5 = vshrl.u32 %v1801_v19, %v1120_v55  ;;  %v1132_v18 = vshrl.u32 %v1803_v23, %v1120_v55  ;;  %v985_v24 = vsub.s32 4, %v1958_v46  ;;  %v1135_v26 = vshrl.u32 %v1804_v30, %v1120_v55 }
 0x133   : > { %v1452_v10 = vmin.u32 %v965_v63, %v963_v56  ;;  %v1976_v7 = vshrl.u32 %v857_v1, 30  ;;  %v1130_v8 = vor.u32 %v1129_v2, %v1128_v14  ;;  %v1124_v15 = vor.u32 %v1123_v4, %v1122_v62 }
 0x134   : > { %v1127_v28 = vor.u32 %v1126_v5, %v1125_v20  ;;  %v1133_v29 = vor.u32 %v1132_v18, %v1131_v22  ;;  %v1121_v32 = vshrl.u32 %v1799_v13, %v1120_v55  ;;  %v1134_v33 = vshll.u32 %v1803_v23, %v1119_v49 }
 0x135   : > { %v967_v60 = vclz %v1452_v10  ;;  %v859_v25 = vshll.u32 %v1976_v7, 30  ;;  %v1006_v34 = vshrl.u32 %v1005_v6, 23  ;;  %vm1137_vm1 = vcmp.lt.s32.totalorder %v1118_v12, 1 }
 0x136   : > { %vm1138_vm2 = vcmp.lt.s32.totalorder %v1118_v12, 2  ;;  %vm1140_vm3 = vcmp.lt.s32.totalorder %v1118_v12, 4  ;;  %v1136_v37 = vor.u32 %v1135_v26, %v1134_v33  ;;  %v1145_v43 = vsel %vm1137_vm1, %v1124_v15, %v1127_v28 }
 0x137   : > { %v1453_v27 = vadd.s32 4294967294, %v967_v60  ;;  %v1986_v31 = vsub.s32 %v856_v58, %v859_v25  ;;  %v1142_v38 = vsel %vm1140_vm3, %v1130_v8, 2102212464  ;;  %v1146_v16 = vsel %vm1140_vm3, %v1133_v29, 920167782 }
 0x138   : > { %vm1139_vm4 = vcmp.lt.s32.totalorder %v1118_v12, 3  ;;  %v1141_v51 = vsel %vm1137_vm1, %v1121_v32, %v1124_v15  ;;  %v1149_v55 = vsel %vm1137_vm1, %v1127_v28, %v1130_v8  ;;  %v1150_v1 = vsel %vm1140_vm3, %v1136_v37, 1326507024 }
 0x139   : > { %vm1454_vm0 = vcmp.lt.s32.totalorder %v1453_v27, 0  ;;  %v862_v36 = vsub.s32 0, %v1986_v31  ;;  %v1147_v54 = vsel %vm1139_vm4, %v1130_v8, %v1146_v16  ;;  %v1143_v58 = vsel %vm1139_vm4, %v1127_v28, %v1142_v38 }
 0x13a   : > { %v970_v35 = vsel %vm1454_vm0, 0, %v1453_v27  ;;  %v1148_v63 = vsel %vm1138_vm2, %v1145_v43, %v1147_v54  ;;  %v1151_v4 = vsel %vm1139_vm4, %v1133_v29, %v1150_v1  ;;  %v1144_v60 = vsel %vm1138_vm2, %v1141_v51, %v1143_v58 }
 0x13b   : > { %v971_v40 = vsub.s32 32, %v970_v35  ;;  %v975_v41 = vsub.s32 4294967266, %v970_v35  ;;  %v972_v48 = vshll.u32 %v963_v56, %v970_v35  ;;  %v1448_v49 = vmin.u32 %v862_v36, %v1986_v31 }
 0x13c   : > { %v1455_v56 = vadd.s32 4294967169, %v1006_v34  ;;  %v1152_v6 = vsel %vm1138_vm2, %v1149_v55, %v1151_v4  ;;  %v986_v22 = vsel %vm901_vm15, %v985_v24, %v1958_v46  ;;  %v852_v25 = vadd.s32 %v1948_v39, %v1954_v42 }
 0x13d   : > { %v973_v52 = vshrl.u32 %v955_v0, %v971_v40  ;;  %v976_v53 = vadd.s32 127, %v975_v41  ;;  %v864_v57 = vclz %v1448_v49  ;;  %v882_v28 = vsub.s32 4, %v1976_v7 }
 0x13e   : > { %v2002_v14 = vmul.u32.u64.low %v1971_v3, %v1148_v63  ;;  %v2003_v0 = vmul.u32.u64.high %v1971_v3, %v1148_v63, %v2002_v14  ;;  %v2008_v62 = vmul.u32.u64.low %v1971_v3, %v1152_v6  ;;  %v2009_v20 = vmul.u32.u64.high %v1971_v3, %v1152_v6, %v2008_v62 }
 0x13f   : > { %v974_v2 = vor.u32 %v973_v52, %v972_v48  ;;  %v977_v10 = vshll.u32 %v976_v53, 23  ;;  %v1449_v5 = vadd.s32 4294967294, %v864_v57  ;;  %v1012_v8 = vadd.s32 1, %v1455_v56 }
 0x140   : > { %v1160_v32 = vmul.u32 %v1971_v3, %v1144_v60  ;;  %v1163_v33 = vadd.s32 1, %v2003_v0  ;;  %vm1162_vm6 = vc.u32 %v2009_v20, %v2002_v14  ;;  %vm2025_vm8 = vcmp.le.f32.partialorder %v899_v47, 0.7853982 }
 0x141   : > { %v978_v18 = vor.u32 4788187, %v977_v10  ;;  %vm1450_vm5 = vcmp.lt.s32.totalorder %v1449_v5, 0  ;;  %v981_v27 = vcvt.s32.f32 %v974_v2  ;;  %vm1013_vm7 = vcmp.gt.s32.totalorder %v1012_v8, 0 }
 0x142   : > { %v867_v15 = vsel %vm1450_vm5, 0, %v1449_v5  ;;  %v1164_v46 = vsel %vm1162_vm6, %v1163_v33, %v2003_v0  ;;  %v1014_v24 = vsel %vm1013_vm7, %v1012_v8, 0  ;;  %vm798_vm9 = vcmp.lt.s32.totalorder %v1874_v45, 0 }
 0x143   : > { %v979_v26 = vand.u32 2147483647, %v978_v18  ;;  %v868_v12 = vsub.s32 32, %v867_v15  ;;  %v872_v29 = vsub.s32 4294967266, %v867_v15  ;;  %v869_v35 = vshll.u32 %v1986_v31, %v867_v15 }
 0x144   : > { %v1165_v37 = vadd.s32 %v1164_v46, %v1160_v32  ;;  %v1016_v38 = vand.u32 31, %v1014_v24  ;;  %v988_v31 = vsel %vm2025_vm8, 0, %v986_v22  ;;  %v1009_v47 = vand.u32 8388607, %v1002_v9 }
 0x145   : > { %v982_v34 = vmul.f32 %v981_v27, %v979_v26  ;;  %v870_v39 = vshrl.u32 %v852_v25, %v868_v12  ;;  %v873_v42 = vadd.s32 127, %v872_v29  ;;  %v2042_v52 = vsel %vm798_vm9, %v882_v28, %v1976_v7 }
 0x146   : > { %v1166_v16 = vadd.s32 536870912, %v1165_v37  ;;  %v1017_v48 = vsub.s32 32, %v1016_v38  ;;  %v2044_v53 = vand.u32 3, %v988_v31  ;;  %vm2050_vm10 = vcmp.le.f32.partialorder %v796_v50, 0.7853982 }
 0x147   : > { %v983_v3 = vxor.u32 2147483648, %v982_v34  ;;  %v871_v40 = vor.u32 %v870_v39, %v869_v35  ;;  %v874_v41 = vshll.u32 %v873_v42, 23  ;;  %v885_v63 = vsel %vm2050_vm10, 0, %v2042_v52 }
 0x148   : > { %v2046_v54 = vshrl.u32 %v1166_v16, 30  ;;  %v1010_v1 = vor.u32 8388608, %v1009_v47  ;;  %v1020_v2 = vshrl.u32 %v1800_v17, %v1017_v48  ;;  %v1023_v4 = vshrl.u32 %v1801_v19, %v1017_v48 }
 0x149   : > { %v984_v43 = vsel %vm901_vm15, %v983_v3, %v982_v34  ;;  %v875_v51 = vor.u32 4788187, %v874_v41  ;;  %v878_v58 = vcvt.s32.f32 %v871_v40  ;;  %v1026_v56 = vshrl.u32 %v1802_v21, %v1017_v48 }
 0x14a   : > { %v987_v49 = vsel %vm2025_vm8, %v1872_v44, %v984_v43  ;;  %v1168_v7 = vshll.u32 %v2046_v54, 30  ;;  %v1029_v50 = vshrl.u32 %v1803_v23, %v1017_v48  ;;  %vm997_vm11 = vcmp.eq.s32.totalorder %v2044_v53, 2 }
 0x14b   : > { %1695 = vcosq.f32 %v987_v49  ;;  %v876_v57 = vand.u32 2147483647, %v875_v51  ;;  %v2065_v6 = vshrl.u32 %v1014_v24, 5  ;;  %v1019_v0 = vshll.u32 %v1799_v13, %v1016_v38 }
 0x14c   : > { %1697 = vsinq.f32 %v987_v49  ;;  %v2063_v5 = vsub.s32 %v1165_v37, %v1168_v7  ;;  %v1022_v18 = vshll.u32 %v1800_v17, %v1016_v38  ;;  %vm994_vm12 = vcmp.eq.s32.totalorder %v2044_v53, 0 }
 0x14d   : > { %v879_v10 = vmul.f32 %v878_v58, %v876_v57  ;;  %v1025_v62 = vshll.u32 %v1801_v19, %v1016_v38  ;;  %v1028_v22 = vshll.u32 %v1802_v21, %v1016_v38  ;;  %v1032_v25 = vshrl.u32 %v1804_v30, %v1017_v48 }
 0x14e   : > { %vm993_vm13 = vcmp.lt.s32.totalorder %v2044_v53, 2  ;;  %v1161_v8 = vadd.s32 %v2002_v14, %v2009_v20  ;;  %v1171_v26 = vsub.s32 0, %v2063_v5  ;;  %v1021_v27 = vor.u32 %v1020_v2, %v1019_v0 }
 0x14f   : > { %v880_v60 = vxor.u32 2147483648, %v879_v10  ;;  %v1031_v17 = vshll.u32 %v1803_v23, %v1016_v38  ;;  %vm991_vm14 = vweird.f32 %v1872_v44  ;;  %v1024_v19 = vor.u32 %v1023_v4, %v1022_v18 }
 0x150   : > { %v1027_v28 = vor.u32 %v1026_v56, %v1025_v62  ;;  %v1030_v21 = vor.u32 %v1029_v50, %v1028_v22  ;;  %v1460_v14 = vmin.u32 %v1171_v26, %v2063_v5  ;;  %v2086_v12 = vshll.u32 %v1010_v1, 8 }
 0x151   : > { %v881_v15 = vsel %vm798_vm9, %v880_v60, %v879_v10  ;;  %v1033_v20 = vor.u32 %v1032_v25, %v1031_v17  ;;  %v1018_v23 = vshrl.u32 %v1799_v13, %v1017_v48  ;;  %vm1034_vm15 = vcmp.lt.s32.totalorder %v2065_v6, 1 }
 0x152   : > { %v884_v30 = vsel %vm2050_vm10, %v1874_v45, %v881_v15  ;;  %vm1035_vm0 = vcmp.lt.s32.totalorder %v2065_v6, 2  ;;  %v1173_v32 = vclz %v1460_v14  ;;  %vm1036_vm1 = vcmp.lt.s32.totalorder %v2065_v6, 3 }
 0x153   : > { %1699 = vcosq.f32 %v884_v30  ;;  %vm1037_vm2 = vcmp.lt.s32.totalorder %v2065_v6, 4  ;;  %v1042_v35 = vsel %vm1034_vm15, %v1021_v27, %v1024_v19  ;;  %v1046_v13 = vsel %vm1034_vm15, %v1024_v19, %v1027_v28 }
 0x154   : > { %1701 = vsinq.f32 %v884_v30  ;;  %v1043_v39 = vsel %vm1037_vm2, %v1030_v21, 920167782  ;;  %v1461_v46 = vadd.s32 4294967294, %v1173_v32  ;;  %v1047_v36 = vsel %vm1037_vm2, %v1033_v20, 1326507024 }
 0x155   : > { %v1696_v29 = vpop.eup %1695  ;;  %v1044_v24 = vsel %vm1036_vm1, %v1027_v28, %v1043_v39  ;;  %v1038_v37 = vsel %vm1034_vm15, %v1018_v23, %v1021_v27  ;;  %v1039_v38 = vsel %vm1037_vm2, %v1027_v28, 2102212464  ;;  %v1048_v31 = vsel %vm1036_vm1, %v1030_v21, %v1047_v36 }
 0x156   : > { %v1698_v33 = vpop.eup %1697  ;;  %v998_v34 = vxor.u32 2147483648, %v1696_v29  ;;  %vm1462_vm3 = vcmp.lt.s32.totalorder %v1461_v46, 0  ;;  %v1045_v41 = vsel %vm1035_vm0, %v1042_v35, %v1044_v24  ;;  %v1049_v43 = vsel %vm1035_vm0, %v1046_v13, %v1048_v31 }
 0x157   : > { %v995_v42 = vxor.u32 2147483648, %v1698_v33  ;;  %v1176_v47 = vsel %vm1462_vm3, 0, %v1461_v46  ;;  %v2114_v48 = vmul.u32.u64.low %v2086_v12, %v1049_v43  ;;  %v2115_v49 = vmul.u32.u64.high %v2086_v12, %v1049_v43, %v2114_v48 }
 0x158   : > { %v999_v3 = vsel %vm997_vm11, %v998_v34, %v1698_v33  ;;  %v1177_v57 = vsub.s32 32, %v1176_v47  ;;  %v1181_v58 = vsub.s32 4294967266, %v1176_v47  ;;  %v1040_v7 = vsel %vm1036_vm1, %v1024_v19, %v1039_v38 }
 0x159   : > { %v996_v40 = vsel %vm994_vm12, %v1696_v29, %v995_v42  ;;  %v889_v53 = vand.u32 3, %v885_v63  ;;  %v2129_v1 = vmul.u32.u64.low %v2086_v12, %v1045_v41  ;;  %v2130_v2 = vmul.u32.u64.high %v2086_v12, %v1045_v41, %v2129_v1 }
 0x15a   : > { %v1000_v16 = vsel %vm993_vm13, %v996_v40, %v999_v3  ;;  %v1178_v44 = vshll.u32 %v2063_v5, %v1176_v47  ;;  %v1179_v10 = vshrl.u32 %v1161_v8, %v1177_v57  ;;  %v1182_v4 = vadd.s32 127, %v1181_v58 }
 0x15b   : > { %v1001_v51 = vsel %vm991_vm14, nan, %v1000_v16  ;;  %v1041_v50 = vsel %vm1035_vm0, %v1038_v37, %v1040_v7  ;;  %vm1059_vm4 = vc.u32 %v2115_v49, %v2129_v1  ;;  %vm894_vm5 = vcmp.eq.s32.totalorder %v889_v53, 2 }
 0x15c   : > { %1209 = vst [vmem:[%s2121_s6 + $0x8] sm:$0xff] %v1001_v51  ;;  %v1180_v60 = vor.u32 %v1179_v10, %v1178_v44  ;;  %v1183_v62 = vshll.u32 %v1182_v4, 23  ;;  %v1060_v55 = vadd.s32 1, %v2130_v2  ;;  %vm891_vm6 = vcmp.eq.s32.totalorder %v889_v53, 0 }
 0x15d   : > { %v1700_v56 = vpop.eup %1699  ;;  %v1057_v22 = vmul.u32 %v2086_v12, %v1041_v50  ;;  %vm888_vm7 = vweird.f32 %v1874_v45  ;;  %vm890_vm8 = vcmp.lt.s32.totalorder %v889_v53, 2  ;;  %vm1107_vm9 = vcmp.lt.s32.totalorder %v1884_v59, 0 }
 0x15e   : > { %v1702_v0 = vpop.eup %1701  ;;  %v895_v18 = vxor.u32 2147483648, %v1700_v56  ;;  %v1184_v5 = vor.u32 4788187, %v1183_v62  ;;  %v1061_v25 = vsel %vm1059_vm4, %v1060_v55, %v2130_v2  ;;  %v1187_v27 = vcvt.s32.f32 %v1180_v60 }
 0x15f   : > { %v892_v52 = vxor.u32 2147483648, %v1702_v0  ;;  %v1062_v17 = vadd.s32 %v1061_v25, %v1057_v22  ;;  %v1191_v14 = vsub.s32 4, %v2046_v54  ;;  %vm1106_vm10 = vcmp.le.f32.partialorder %v1105_v11, 0.7853982 }
 0x160   : > { %v896_v63 = vsel %vm894_vm5, %v895_v18, %v1702_v0  ;;  %v1185_v26 = vand.u32 2147483647, %v1184_v5  ;;  %v1058_v3 = vadd.s32 %v2129_v1, %v2115_v49  ;;  %vm1197_vm15 = vweird.f32 %v1884_v59 }
 0x161   : > { %v893_v6 = vsel %vm891_vm6, %v1700_v56, %v892_v52  ;;  %v1063_v28 = vadd.s32 536870912, %v1062_v17  ;;  %v1192_v29 = vsel %vm1107_vm9, %v1191_v14, %v2046_v54  ;;  %vm1004_vm0 = vcmp.lt.s32.totalorder %v1886_v61, 0 }
 0x162   : > { %v897_v8 = vsel %vm890_vm8, %v893_v6, %v896_v63  ;;  %v1188_v19 = vmul.f32 %v1187_v27, %v1185_v26  ;;  %v1194_v33 = vsel %vm1106_vm10, 0, %v1192_v29  ;;  %vm1003_vm1 = vcmp.le.f32.partialorder %v1002_v9, 0.7853982 }
 0x163   : > { %v898_v15 = vsel %vm888_vm7, nan, %v897_v8  ;;  %v1064_v30 = vshrl.u32 %v1063_v28, 30  ;;  %v1198_v39 = vand.u32 3, %v1194_v33  ;;  %vm1094_vm5 = vweird.f32 %v1886_v61 }
 0x164   : > { %1208 = vst [vmem:[%s2121_s6] sm:$0xff] %v898_v15  ;;  %v1189_v21 = vxor.u32 2147483648, %v1188_v19 }
 0x165   : > { %v1065_v20 = vshll.u32 %v1064_v30, 30  ;;  %vm1203_vm12 = vcmp.eq.s32.totalorder %v1198_v39, 2  ;;  %vm1199_vm13 = vcmp.lt.s32.totalorder %v1198_v39, 2  ;;  %vm1200_vm14 = vcmp.eq.s32.totalorder %v1198_v39, 0 }
 0x166   : > { %v1190_v45 = vsel %vm1107_vm9, %v1189_v21, %v1188_v19  ;;  %v1088_v2 = vsub.s32 4, %v1064_v30 }
 0x167   : > { %v1193_v12 = vsel %vm1106_vm10, %v1884_v59, %v1190_v45  ;;  %v1066_v23 = vsub.s32 %v1062_v17, %v1065_v20 }
 0x168   : > { %1703 = vcosq.f32 %v1193_v12  ;;  %v1089_v59 = vsel %vm1004_vm0, %v1088_v2, %v1064_v30 }
 0x169   : > { %1705 = vsinq.f32 %v1193_v12  ;;  %v1068_v32 = vsub.s32 0, %v1066_v23  ;;  %v1091_v10 = vsel %vm1003_vm1, 0, %v1089_v59 }
 0x16a   : > { %v1095_v4 = vand.u32 3, %v1091_v10 }
 0x16b   : > { %v1456_v34 = vmin.u32 %v1068_v32, %v1066_v23 }
 0x16c   : > { %vm1100_vm2 = vcmp.eq.s32.totalorder %v1095_v4, 2  ;;  %vm1097_vm3 = vcmp.eq.s32.totalorder %v1095_v4, 0  ;;  %vm1096_vm4 = vcmp.lt.s32.totalorder %v1095_v4, 2 }
 0x16d   : > { %v1070_v35 = vclz %v1456_v34 }
 0x16f   : > { %v1457_v13 = vadd.s32 4294967294, %v1070_v35 }
 0x171   : > { %vm1458_vm11 = vcmp.lt.s32.totalorder %v1457_v13, 0 }
 0x172   : > { %v1704_v42 = vpop.eup %1703  ;;  %v1073_v24 = vsel %vm1458_vm11, 0, %v1457_v13 }
 0x173   : > { %v1706_v46 = vpop.eup %1705  ;;  %v1204_v11 = vxor.u32 2147483648, %v1704_v42  ;;  %v1074_v37 = vsub.s32 32, %v1073_v24  ;;  %v1078_v38 = vsub.s32 4294967266, %v1073_v24  ;;  %v1075_v40 = vshll.u32 %v1066_v23, %v1073_v24 }
 0x174   : > { %v1201_v36 = vxor.u32 2147483648, %v1706_v46 }
 0x175   : > { %v1205_v54 = vsel %vm1203_vm12, %v1204_v11, %v1706_v46  ;;  %v1076_v41 = vshrl.u32 %v1058_v3, %v1074_v37  ;;  %v1079_v43 = vadd.s32 127, %v1078_v38 }
 0x176   : > { %v1202_v31 = vsel %vm1200_vm14, %v1704_v42, %v1201_v36 }
 0x177   : > { %v1206_v16 = vsel %vm1199_vm13, %v1202_v31, %v1205_v54  ;;  %v1077_v48 = vor.u32 %v1076_v41, %v1075_v40  ;;  %v1080_v51 = vshll.u32 %v1079_v43, 23 }
 0x178   : > { %v1207_v47 = vsel %vm1197_vm15, nan, %v1206_v16 }
 0x179   : > { %1211 = vst [vmem:[%s2121_s6 + $0x18] sm:$0xff] %v1207_v47  ;;  %v1081_v57 = vor.u32 4788187, %v1080_v51  ;;  %v1084_v7 = vcvt.s32.f32 %v1077_v48 }
 0x17b   : > { %v1082_v58 = vand.u32 2147483647, %v1081_v57 }
 0x17d   : > { %v1085_v49 = vmul.f32 %v1084_v7, %v1082_v58 }
 0x17f   : > { %v1086_v53 = vxor.u32 2147483648, %v1085_v49 }
 0x181   : > { %v1087_v1 = vsel %vm1004_vm0, %v1086_v53, %v1085_v49 }
 0x182   : > { %v1090_v44 = vsel %vm1003_vm1, %v1886_v61, %v1087_v1 }
 0x183   : > { %1707 = vcosq.f32 %v1090_v44 }
 0x184   : > { %1709 = vsinq.f32 %v1090_v44 }
 0x18d   : > { %v1708_v56 = vpop.eup %1707 }
 0x18e   : > { %v1710_v50 = vpop.eup %1709  ;;  %v1101_v0 = vxor.u32 2147483648, %v1708_v56  ;;  %1218 = sbr.rel (!%p1850_p4) target bundleno = 454 (0x1c6), region = 36 }
 0x18f   : > { %v1098_v18 = vxor.u32 2147483648, %v1710_v50 }
 0x190   : > { %v1102_v60 = vsel %vm1100_vm2, %v1101_v0, %v1710_v50 }
 0x191   : > { %v1099_v62 = vsel %vm1097_vm3, %v1708_v56, %v1098_v18 }
 0x192   : > { %v1103_v9 = vsel %vm1096_vm4, %v1099_v62, %v1102_v60 }
 0x193   : > { %v1104_v52 = vsel %vm1094_vm5, nan, %v1103_v9 }
 0x194   : > { %1210 = vst [vmem:[%s2121_s6 + $0x10] sm:$0xff] %v1104_v52 }
 0x195   : > { %s2228_s7 = smov (!%p1221_p8, %s1220_s7), 4 }
 0x196   : > { %s1465_s12 = sshll.u32 %s2228_s7, 7 }
 0x197   : > { %p1468_p9 = scmp.eq.s32.totalorder %s1465_s12, 0 }
 0x198   : > { %s2169_s14 = sshrl.u32 (!%p1468_p9), %s2228_s7, 2 }
 0x199   : > { %1229 = sbr.rel (%p1468_p9) target bundleno = 454 (0x1c6), region = 40  ;;  %p1469_p10 = scmp.le.s32.totalorder (!%p1468_p9), %s2169_s14, 0 }
 0x1a0   : > { %1395 = sbr.rel (%p1469_p10) target bundleno = 433 (0x1b1), region = 116  ;;  %s2221_s15 = smov (!%p1469_p10), %s2163_s11 }
 0x1a1   : > { %s2222_s17 = smov (!%p1469_p10), %s2121_s6  ;;  %s2178_s18 = smov (!%p1469_p10), 0  }
 0x1a2   : > { %s1779_s20 = smov (!%p1469_p10), 0  }
 0x1a7 LB: >> { %v1297_v61 = vld [vmem:[%s1773_s17] sm:$0xff]  ;;  %v1299_v55 = vld [vmem:[%s1773_s17 + $0x8] sm:$0xff]  ;;  %v1301_v63 = vld [vmem:[%s1773_s17 + $0x10] sm:$0xff]  ;;  %s1305_s21 = sadd.s32 1, %s1777_s18  ;;  %s1291_s20 = sadd.s32 1, %s1781_s20   ;;  %s1781_s20 = sphi %s1779_s20, %s1291_s20   ;;  %s1777_s18 = sphi %s2178_s18, %s2223_s18   ;;  %s1773_s17 = sphi %s2222_s17, %s1310_s17   ;;  %s1769_s15 = sphi %s2221_s15, %s1311_s15  }
 0x1a8   : >> { %1298 = vst [vmem:[%s1769_s15] sm:$0xff] %v1297_v61  ;;  %1300 = vst [vmem:[%s1769_s15 + $0x8] sm:$0xff] %v1299_v55  ;;  %v1303_v5 = vld [vmem:[%s1773_s17 + $0x18] sm:$0xff]  ;;  %p1306_p11 = scmp.ge.s32.totalorder %s1305_s21, %s2169_s14  ;;  %p1290_p12 = scmp.ge.s32.totalorder %s1291_s20, %s2169_s14 }
 0x1a9   : >> { %1302 = vst [vmem:[%s1769_s15 + $0x10] sm:$0xff] %v1301_v63  ;;  %1304 = vst [vmem:[%s1769_s15 + $0x18] sm:$0xff] %v1303_v5 }
 0x1aa   : >> { %s2230_s21 = smov (%p1306_p11, %s1305_s21), 0  ;;  %1293 = sbr.rel (!%p1290_p12) target bundleno = 423 (0x1a7), region = 122 }
 0x1ab   : >> { %s1470_s22 = sshll.u32 %s2230_s21, 5  ;;  %s2223_s18 = smov %s2230_s21 }
 0x1ac   : >> { %s1310_s17 = scalar_lea.vmem %s2121_s6, %s1470_s22 [#allocation2]   ;;  %s1311_s15 = scalar_lea.vmem %s2163_s11, %s1470_s22  }
 0x1b1 PF: > { %s2194_s23 = sand.u32 3, %s2228_s7   ;;  %s1481_s24 = sshll.u32 %s2169_s14, 5 }
 0x1b2   : > { %s1316_s25 = scalar_lea.vmem %s2121_s6, %s1481_s24 [#allocation2]   ;;  %s1318_s26 = scalar_lea.vmem %s2163_s11, %s1481_s24  }
 0x1b3   : > { %p1475_p13 = scmp.le.s32.totalorder %s2194_s23, 0 }
 0x1b4   : > { %s1783_s27 = smov (!%p1475_p13), %s1318_s26   ;;  %s1787_s28 = smov (!%p1475_p13), %s1316_s25  }
 0x1b5   : > { %1409 = sbr.rel (%p1475_p13) target bundleno = 454 (0x1c6), region = 127  ;;  %s1791_s29 = smov (!%p1475_p13), 0  }
 0x1b6   : > { %s1795_s30 = smov (!%p1475_p13), 0  }
 0x1bc LB: >> { %v1328_v22 = vld [vmem:[%s1789_s28] sm:$0xff]  ;;  %s1330_s4 = sadd.s32 1, %s1793_s29  ;;  %s1322_s30 = sadd.s32 1, %s1797_s30   ;;  %s1797_s30 = sphi %s1795_s30, %s1322_s30   ;;  %s1793_s29 = sphi %s1791_s29, %s1792_s29   ;;  %s1789_s28 = sphi %s1787_s28, %s1335_s28   ;;  %s1785_s27 = sphi %s1783_s27, %s1336_s27  }
 0x1bd   : >> { %1329 = vst [vmem:[%s1785_s27] sm:$0xff] %v1328_v22  ;;  %p1331_p0 = scmp.ge.s32.totalorder %s1330_s4, %s2194_s23  ;;  %p1321_p1 = scmp.ge.s32.totalorder %s1322_s30, %s2194_s23 }
 0x1bf   : >> { %s2232_s4 = smov (%p1331_p0, %s1330_s4), 0  ;;  %1324 = sbr.rel (!%p1321_p1) target bundleno = 444 (0x1bc), region = 133 }
 0x1c0   : >> { %s1476_s5 = sshll.u32 %s2232_s4, 3  ;;  %s1792_s29 = smov %s2232_s4  }
 0x1c1   : >> { %s1335_s28 = scalar_lea.vmem %s1316_s25, %s1476_s5 [#allocation2]   ;;  %s1336_s27 = scalar_lea.vmem %s1318_s26, %s1476_s5  }
 0x1c6 PF: > { %p10_p2 = scmp.ge.s32.totalorder %s1840_s16, 4   ;;  %s2224_s12 = smov %s1761_s13 }
 0x1c7   : > { %s2225_s13 = smov %s1848_s19  ;;  %s2226_s14 = smov %s1840_s16 }
 0x1c8   :  { %12 = sbr.rel (!%p10_p2) target bundleno = 2 (0x2), region = 144 }

</bundles_post_ra>
